<compile_context>
chip_gen: v5e
topology: v5e:2x2
jax: 0.10.0
libtpu: 0.0.40
codegen_flags: <defaults>
</compile_context>

<pallas_src>
import jax
import jax.numpy as jnp
from jax.experimental import pallas as pl
from jax.experimental.pallas import tpu as pltpu

KH = KW = 4
STRIDE = 2
PAD = 1
BN_EPS = 1e-5
LANE = 128


def _round_up(x, m):
    return (x + m - 1) // m * m


# ---------------------------------------------------------------------------
# Phase 1: conv tile (MXU matmul) + running per-channel sum / sum-of-squares.
# ---------------------------------------------------------------------------
def _conv_stats_kernel(p_ref, w_ref, conv_ref, sum_ref, sq_ref):
    # p_ref:    (TILE_M, Kp)   im2col rows (compute dtype)
    # w_ref:    (Kp, Cp)       weights, VMEM-resident across all M tiles (constant index_map)
    # conv_ref: (TILE_M, Cp)   f32 conv output tile
    # sum_ref, sq_ref: (1, Cp) f32 accumulators, VMEM-resident across the grid
    @pl.when(pl.program_id(0) == 0)
    def _():
        sum_ref[...] = jnp.zeros_like(sum_ref)
        sq_ref[...] = jnp.zeros_like(sq_ref)

    conv = jnp.dot(p_ref[...], w_ref[...], preferred_element_type=jnp.float32)
    conv_ref[...] = conv
    sum_ref[...] += jnp.sum(conv, axis=0, keepdims=True)
    sq_ref[...] += jnp.sum(conv * conv, axis=0, keepdims=True)


# ---------------------------------------------------------------------------
# Phase 2: lane-dense affine normalize + ReLU (embarrassingly parallel over M).
# ---------------------------------------------------------------------------
def _norm_relu_kernel(conv_ref, scale_ref, shift_ref, out_ref):
    y = conv_ref[...] * scale_ref[...] + shift_ref[...]
    out_ref[...] = jnp.maximum(y, 0.0)


def _im2col(x_nhwc, Ho, Wo):
    # Zero padding of 1 on each spatial side, then gather 4x4 patches with stride 2.
    xp = jnp.pad(x_nhwc, ((0, 0), (PAD, PAD), (PAD, PAD), (0, 0)))
    slices = []
    for di in range(KH):
        for dj in range(KW):
            slices.append(xp[:, di:di + STRIDE * Ho:STRIDE, dj:dj + STRIDE * Wo:STRIDE, :])
    patches = jnp.stack(slices, axis=-2)  # (N, Ho, Wo, KH*KW, Cin)
    N = x_nhwc.shape[0]
    Cin = x_nhwc.shape[-1]
    return patches.reshape(N, Ho, Wo, KH * KW * Cin)


def downsampling_block(x_nchw, w_oihw, bias, gamma, beta, *,
                       compute_dtype=jnp.float32, tile_m=512):
    """Forward pass of DownsamplingBlock. x_nchw: (N, Cin, H, W) float32.

    `bias` is accepted for API parity but not used in the compute path: with train-mode
    BatchNorm immediately after the conv, the bias cancels exactly in the mean subtraction.
    """
    del bias  # mathematically cancelled by train-mode BN mean subtraction

    N, Cin, H, W = x_nchw.shape
    Cout = w_oihw.shape[0]
    Ho = (H + 2 * PAD - KH) // STRIDE + 1
    Wo = (W + 2 * PAD - KW) // STRIDE + 1

    M = N * Ho * Wo
    K = KH * KW * Cin
    Kp = _round_up(K, LANE)       # pad contraction dim to 128 lanes (MXU fill)
    Cp = _round_up(Cout, LANE)    # pad channel dim to 128 lanes (lane-dense stores)

    # Tile size over M: multiple of 8 sublanes, capped by tile_m.
    tm = min(tile_m, _round_up(M, 8))
    Mp = _round_up(M, tm)

    # im2col (NHWC) -> (M, K), then zero-pad to (Mp, Kp).
    x_nhwc = jnp.transpose(x_nchw, (0, 2, 3, 1)).astype(jnp.float32)
    patches = _im2col(x_nhwc, Ho, Wo).reshape(M, K)
    patches_p = jnp.pad(patches, ((0, Mp - M), (0, Kp - K))).astype(compute_dtype)

    # Torch weight (Cout, Cin, KH, KW) -> (KH, KW, Cin, Cout) -> (K, Cout), zero-pad to (Kp, Cp).
    w2d = jnp.transpose(w_oihw, (2, 3, 1, 0)).reshape(K, Cout).astype(jnp.float32)
    w_p = jnp.pad(w2d, ((0, Kp - K), (0, Cp - Cout))).astype(compute_dtype)

    gamma_p = jnp.pad(gamma.astype(jnp.float32).reshape(1, Cout), ((0, 0), (0, Cp - Cout)))
    beta_p = jnp.pad(beta.astype(jnp.float32).reshape(1, Cout), ((0, 0), (0, Cp - Cout)))

    grid = (Mp // tm,)

    # -------- Phase 1: conv tiles + batch statistics (accumulated across the grid). --------
    conv_p, s_sum, s_sq = pl.pallas_call(
        _conv_stats_kernel,
        out_shape=(
            jax.ShapeDtypeStruct((Mp, Cp), jnp.float32),
            jax.ShapeDtypeStruct((1, Cp), jnp.float32),
            jax.ShapeDtypeStruct((1, Cp), jnp.float32),
        ),
        grid=grid,
        in_specs=[
            pl.BlockSpec((tm, Kp), lambda i: (i, 0)),   # patches: new M tile per step
            pl.BlockSpec((Kp, Cp), lambda i: (0, 0)),   # weights: resident across all steps
        ],
        out_specs=(
            pl.BlockSpec((tm, Cp), lambda i: (i, 0)),   # conv tile per step
            pl.BlockSpec((1, Cp), lambda i: (0, 0)),    # running sum (accumulator)
            pl.BlockSpec((1, Cp), lambda i: (0, 0)),    # running sum of squares (accumulator)
        ),
        compiler_params=pltpu.CompilerParams(dimension_semantics=("arbitrary",)),
    )(patches_p, w_p)

    # -------- Finalize BN statistics (tiny per-channel math, plain XLA). --------
    # Zero-padded M rows contribute exactly 0 to the sums (no bias), so dividing by the true M
    # gives exact batch statistics.
    mean = s_sum / M
    var = jnp.maximum(s_sq / M - mean * mean, 0.0)   # biased variance (PyTorch train-mode BN)
    inv_std = jax.lax.rsqrt(var + BN_EPS)
    scale = gamma_p * inv_std
    shift = beta_p - mean * scale

    # -------- Phase 2: normalize + ReLU, lane-dense, parallel over M tiles. --------
    out_p = pl.pallas_call(
        _norm_relu_kernel,
        out_shape=jax.ShapeDtypeStruct((Mp, Cp), jnp.float32),
        grid=grid,
        in_specs=[
            pl.BlockSpec((tm, Cp), lambda i: (i, 0)),
            pl.BlockSpec((1, Cp), lambda i: (0, 0)),
            pl.BlockSpec((1, Cp), lambda i: (0, 0)),
        ],
        out_specs=pl.BlockSpec((tm, Cp), lambda i: (i, 0)),
        compiler_params=pltpu.CompilerParams(dimension_semantics=("parallel",)),
    )(conv_p, scale, shift)

    # Strip padding, (M, Cout) -> (N, Ho, Wo, Cout) -> NCHW.
    out2d = out_p[:M, :Cout]
    return jnp.transpose(out2d.reshape(N, Ho, Wo, Cout), (0, 3, 1, 2))


def _reference(x_nchw, w_oihw, bias, gamma, beta):
    # Pure-JAX reference (conv WITH bias + train-mode BN + ReLU) for self-check.
    x_nhwc = jnp.transpose(x_nchw, (0, 2, 3, 1))
    w_hwio = jnp.transpose(w_oihw, (2, 3, 1, 0))
    conv = jax.lax.conv_general_dilated(
        x_nhwc, w_hwio, window_strides=(STRIDE, STRIDE),
        padding=[(PAD, PAD), (PAD, PAD)],
        dimension_numbers=("NHWC", "HWIO", "NHWC"),
    ) + bias[None, None, None, :]
    mean = jnp.mean(conv, axis=(0, 1, 2), keepdims=True)
    var = jnp.mean((conv - mean) ** 2, axis=(0, 1, 2), keepdims=True)
    y = (conv - mean) * jax.lax.rsqrt(var + BN_EPS) * gamma + beta
    y = jnp.maximum(y, 0.0)
    return jnp.transpose(y, (0, 3, 1, 2))


if __name__ == "__main__":
    key = jax.random.PRNGKey(0)
    N, Cin, H, W = 2, 4, 16, 16
    Cout = 8

    k_x, k_w, k_b = jax.random.split(key, 3)
    x = jax.random.normal(k_x, (N, Cin, H, W), dtype=jnp.float32)

    # Deterministic parameter init mirroring the PyTorch module's __init__:
    # kaiming_uniform_(fan_in, relu) => U(-sqrt(6/fan_in), sqrt(6/fan_in))
    fan_in = Cin * KH * KW
    w_bound = (6.0 / fan_in) ** 0.5
    w = jax.random.uniform(k_w, (Cout, Cin, KH, KW), jnp.float32, -w_bound, w_bound)
    # Conv2d default bias init: U(-1/sqrt(fan_in), 1/sqrt(fan_in))
    b_bound = 1.0 / (fan_in ** 0.5)
    b = jax.random.uniform(k_b, (Cout,), jnp.float32, -b_bound, b_bound)
    # BatchNorm2d affine params
    gamma = jnp.ones((Cout,), jnp.float32)
    beta = jnp.zeros((Cout,), jnp.float32)

    ref = jax.block_until_ready(_reference(x, w, b, gamma, beta))

    # Multi-tile run (tile_m=32 -> 4 grid steps) exercises the cross-tile stats accumulator.
    out_multi = jax.block_until_ready(downsampling_block(x, w, b, gamma, beta, tile_m=32))
    assert out_multi.shape == (N, Cout, H // 2, W // 2), out_multi.shape
    assert jnp.max(jnp.abs(out_multi - ref)) < 1e-4, float(jnp.max(jnp.abs(out_multi - ref)))

    # Default tile size (single tile at this small shape).
    out_single = jax.block_until_ready(downsampling_block(x, w, b, gamma, beta))
    assert out_single.shape == (N, Cout, H // 2, W // 2), out_single.shape
    assert jnp.max(jnp.abs(out_single - ref)) < 1e-4, float(jnp.max(jnp.abs(out_single - ref)))

    print("KERNEL_OK")
</pallas_src>

<mosaic_0001>
module attributes {stable_mosaic.version = 11 : i64} {
  func.func @_conv_stats_kernel(%arg0: i32, %arg1: memref<32x128xf32, #tpu.memory_space<vmem>>, %arg2: memref<128x128xf32, #tpu.memory_space<vmem>>, %arg3: memref<32x128xf32, #tpu.memory_space<vmem>>, %arg4: memref<1x128xf32, #tpu.memory_space<vmem>>, %arg5: memref<1x128xf32, #tpu.memory_space<vmem>>) attributes {dimension_semantics = [#tpu.dimension_semantics<arbitrary>], iteration_bounds = array<i64: 4>, scalar_prefetch = 0 : i64, scratch_operands = 0 : i64, tpu.core_type = #tpu.core_type<tc>, window_params = [{transform_indices = @transform_0, window_bounds = array<i64: 32, 128>}, {pipeline_mode = #tpu.pipeline_mode<synchronous>, transform_indices = @transform_1, window_bounds = array<i64: 128, 128>}, {transform_indices = @transform_2, window_bounds = array<i64: 32, 128>}, {pipeline_mode = #tpu.pipeline_mode<synchronous>, transform_indices = @transform_3, window_bounds = array<i64: 1, 128>}, {pipeline_mode = #tpu.pipeline_mode<synchronous>, transform_indices = @transform_4, window_bounds = array<i64: 1, 128>}]} {
    %c0_i32 = arith.constant 0 : i32
    %0 = arith.cmpi eq, %arg0, %c0_i32 : i32
    %1 = arith.extui %0 : i1 to i32
    %c0_i32_0 = arith.constant 0 : i32
    %2 = arith.cmpi ne, %1, %c0_i32_0 : i32
    scf.if %2 {
      %cst_16 = arith.constant 0.000000e+00 : f32
      %18 = vector.broadcast %cst_16 : f32 to vector<1x128xf32>
      %c0_17 = arith.constant 0 : index
      %c0_18 = arith.constant 0 : index
      %19 = vector.load %arg4[%c0_17, %c0_18] : memref<1x128xf32, #tpu.memory_space<vmem>>, vector<1x128xf32>
      tpu.vector_store %arg4[%c0_17, %c0_18], %18 {strides = array<i32>} : memref<1x128xf32, #tpu.memory_space<vmem>>, vector<1x128xf32>,
      %cst_19 = arith.constant 0.000000e+00 : f32
      %20 = vector.broadcast %cst_19 : f32 to vector<1x128xf32>
      %c0_20 = arith.constant 0 : index
      %c0_21 = arith.constant 0 : index
      %21 = vector.load %arg5[%c0_20, %c0_21] : memref<1x128xf32, #tpu.memory_space<vmem>>, vector<1x128xf32>
      tpu.vector_store %arg5[%c0_20, %c0_21], %20 {strides = array<i32>} : memref<1x128xf32, #tpu.memory_space<vmem>>, vector<1x128xf32>,
    } else {
    }
    %c0 = arith.constant 0 : index
    %c0_1 = arith.constant 0 : index
    %3 = vector.load %arg1[%c0, %c0_1] : memref<32x128xf32, #tpu.memory_space<vmem>>, vector<32x128xf32>
    %c0_2 = arith.constant 0 : index
    %c0_3 = arith.constant 0 : index
    %4 = vector.load %arg2[%c0_2, %c0_3] : memref<128x128xf32, #tpu.memory_space<vmem>>, vector<128x128xf32>
    %cst = arith.constant dense<0.000000e+00> : vector<32x128xf32>
    %5 = tpu.matmul %3, %4, %cst {dimension_numbers = #tpu.dot_dimension_numbers<[1], [0], [0], [1], [0, 0, 1, 1], [], []>} : vector<32x128xf32>, vector<128x128xf32>, vector<32x128xf32> -> vector<32x128xf32>
    %c0_4 = arith.constant 0 : index
    %c0_5 = arith.constant 0 : index
    %6 = vector.load %arg3[%c0_4, %c0_5] : memref<32x128xf32, #tpu.memory_space<vmem>>, vector<32x128xf32>
    tpu.vector_store %arg3[%c0_4, %c0_5], %5 {strides = array<i32>} : memref<32x128xf32, #tpu.memory_space<vmem>>, vector<32x128xf32>,
    %c0_6 = arith.constant 0 : index
    %c0_7 = arith.constant 0 : index
    %7 = vector.load %arg4[%c0_6, %c0_7] : memref<1x128xf32, #tpu.memory_space<vmem>>, vector<1x128xf32>
    %cst_8 = arith.constant dense<0.000000e+00> : vector<128xf32>
    %8 = vector.multi_reduction <add>, %5, %cst_8 [0] : vector<32x128xf32> to vector<128xf32>
    %9 = vector.shape_cast %8 : vector<128xf32> to vector<1x128xf32>
    %10 = arith.addf %7, %9 : vector<1x128xf32>
    %c0_9 = arith.constant 0 : index
    %c0_10 = arith.constant 0 : index
    %11 = vector.load %arg4[%c0_9, %c0_10] : memref<1x128xf32, #tpu.memory_space<vmem>>, vector<1x128xf32>
    tpu.vector_store %arg4[%c0_9, %c0_10], %10 {strides = array<i32>} : memref<1x128xf32, #tpu.memory_space<vmem>>, vector<1x128xf32>,
    %c0_11 = arith.constant 0 : index
    %c0_12 = arith.constant 0 : index
    %12 = vector.load %arg5[%c0_11, %c0_12] : memref<1x128xf32, #tpu.memory_space<vmem>>, vector<1x128xf32>
    %13 = arith.mulf %5, %5 : vector<32x128xf32>
    %cst_13 = arith.constant dense<0.000000e+00> : vector<128xf32>
    %14 = vector.multi_reduction <add>, %13, %cst_13 [0] : vector<32x128xf32> to vector<128xf32>
    %15 = vector.shape_cast %14 : vector<128xf32> to vector<1x128xf32>
    %16 = arith.addf %12, %15 : vector<1x128xf32>
    %c0_14 = arith.constant 0 : index
    %c0_15 = arith.constant 0 : index
    %17 = vector.load %arg5[%c0_14, %c0_15] : memref<1x128xf32, #tpu.memory_space<vmem>>, vector<1x128xf32>
    tpu.vector_store %arg5[%c0_14, %c0_15], %16 {strides = array<i32>} : memref<1x128xf32, #tpu.memory_space<vmem>>, vector<1x128xf32>,
    return
  }
  func.func @transform_0(%arg0: i32) -> (i32, i32) {
    %c0_i32 = arith.constant 0 : i32
    %c0_i32_0 = arith.constant 0 : i32
    return %arg0, %c0_i32 : i32, i32
  }
  func.func @transform_1(%arg0: i32) -> (i32, i32) {
    %c0_i32 = arith.constant 0 : i32
    %c0_i32_0 = arith.constant 0 : i32
    %c0_i32_1 = arith.constant 0 : i32
    return %c0_i32, %c0_i32_0 : i32, i32
  }
  func.func @transform_2(%arg0: i32) -> (i32, i32) {
    %c0_i32 = arith.constant 0 : i32
    %c0_i32_0 = arith.constant 0 : i32
    return %arg0, %c0_i32 : i32, i32
  }
  func.func @transform_3(%arg0: i32) -> (i32, i32) {
    %c0_i32 = arith.constant 0 : i32
    %c0_i32_0 = arith.constant 0 : i32
    %c0_i32_1 = arith.constant 0 : i32
    return %c0_i32, %c0_i32_0 : i32, i32
  }
  func.func @transform_4(%arg0: i32) -> (i32, i32) {
    %c0_i32 = arith.constant 0 : i32
    %c0_i32_0 = arith.constant 0 : i32
    %c0_i32_1 = arith.constant 0 : i32
    return %c0_i32, %c0_i32_0 : i32, i32
  }
}

</mosaic_0001>

<bundles_post_ra>
// kernel: tpu_custom_call.1
= control target key start
LH: loop header
LB: loop body
LE: loop exit
PB: predicated region body
PF: predicated region fallthrough
CT: control target
= control target key end

     0   :  { %10 = vsyncpa [#allocation3], 0  ;;  %s1017_s0 = inlined_call_operand.hbm [shape: f32[128,128], index: 0, kind: input, shape index: {}]   ;;  %s1018_s1 = inlined_call_operand.hbm [shape: f32[128,128], index: 1, kind: input, shape index: {}]   ;;  %s1019_s2 = inlined_call_operand.hbm [shape: f32[128,128], index: 2, kind: output, shape index: {0}]   ;;  %s1020_s3 = inlined_call_operand.hbm [shape: f32[1,128], index: 3, kind: output, shape index: {1}]   ;;  %s1021_s4 = inlined_call_operand.hbm [shape: f32[1,128], index: 4, kind: output, shape index: {2}]  }
   0x1   :  { %12 = vsyncpa [#allocation3 + $0x1], 0 }
   0x2   :  { %13 = vsyncpa [#allocation6], 0 }
   0x3   :  { %14 = vsyncpa [#allocation4], 0 }
   0x4   :  { %16 = vsyncpa [#allocation4 + $0x1], 0 }
   0x5   :  { %17 = vsyncpa [#allocation9], 0  ;;  %s838_s15 = smov 0   ;;  %s840_s16 = smov 0  }
   0x6   :  { %s842_s17 = smov 0   ;;  %s844_s18 = smov 0  }
   0x7 LB: > { %s859_s19 = sadd.s32 4294967295, %s803_s18   ;;  %s466_s20 = sadd.s32 4294967294, %s803_s18   ;;  %s803_s18 = sphi %s844_s18, %s1036_s18   ;;  %s799_s17 = sphi %s842_s17, %s1035_s17   ;;  %s795_s16 = sphi %s840_s16, %s1034_s16   ;;  %s791_s15 = sphi %s838_s15, %s1033_s15  }
   0x8   : > { %p43_p0 = scmp.ne.s32.totalorder %s795_s16, %s791_s15  ;;  %p44_p1 = scmp.eq.s32.totalorder %s859_s19, 0 }
   0x9   : > { %p1022_p2 = scmp.eq.s32.totalorder %s859_s19, 3  ;;  %p94_p3 = scmp.eq.s32.totalorder %s466_s20, 3 }
   0xa   : > { %p868_p4 = por %p44_p1, %p43_p0  ;;  %p467_p5 = scmp.ge.s32.totalorder %s803_s18, 1 }
   0xb   : > { %p873_p6 = por %p94_p3, %p43_p0  ;;  %p143_p7 = scmp.lt.s32.totalorder %s803_s18, 5 }
   0xc   : > { %s154_s25 = sshll.u32 %s1018_s1, 4  ;;  %s805_s27 = smov [#allocation5]   ;;  %s155_s25 = int_to_ptr.hbm [resolvable:$true] %s154_s25 }
   0xd   : > { %p882_p9 = pnand %p467_p5, %p143_p7  ;;  %s156_s28 = sshll.u32 %s805_s27, 4  ;;  %s157_s28 = int_to_ptr.vmem [resolvable:$true] %s156_s28 }
   0xe   : > { %s891_s29 = sadd.s32 1, %s803_s18   ;;  %s806_s30 = smov 128  }
   0xf   : > { %p553_p10 = pneg %p882_p9  ;;  %s807_s5 = smov 8  }
  0x10   : > { %s27_s6 = ssub.s32 %s803_s18, %s891_s29  ;;  %s30_s7 = sadd.s32 1, %s799_s17 }
  0x11   : > { %p554_p11 = pnand %p553_p10, %p44_p1  ;;  %p28_p12 = scmp.eq.s32.totalorder %s27_s6, 0 }
  0x12   : > { %p37_p13 = scmp.ne.s32.totalorder %s799_s17, %s795_s16  ;;  %p38_p0 = scmp.eq.s32.totalorder %s803_s18, 0 }
  0x13   : > { %556 = dma.hbm_to_vmem [thread:$0]  (!%p554_p11), %s155_s25, 2048, %s157_s28, [#allocation6], %s806_s30, %s806_s30, %s807_s5  }
  0x14   : > { %s903_s8 = scalar_select %p28_p12, %s799_s17, %s30_s7  }
  0x15   : > { %p907_p3 = por %p1022_p2, %p37_p13  ;;  %p566_p5 = scmp.lt.s32.totalorder %s803_s18, 4 }
  0x16   : > { %s170_s10 = sand.u32 1, %s799_s17   ;;  %s487_s11 = sshll.u32 %s803_s18, 5 }
  0x17   : > { %p39_p7 = por %p38_p0, %p37_p13  ;;  %s470_s12 = sshll.u32 %s170_s10, 5 }
  0x18   : > { %s179_s20 = scalar_lea.hbm %s1017_s0, %s487_s11  ;;  %s174_s24 = scalar_lea.vmem [#allocation2], %s470_s12 }
  0x19   : > { %s180_s23 = sshll.u32 %s179_s20, 4  ;;  %s182_s25 = sshll.u32 %s174_s24, 4  ;;  %s181_s23 = int_to_ptr.hbm [resolvable:$true] %s180_s23  ;;  %s183_s25 = int_to_ptr.vmem [resolvable:$true] %s182_s25 }
  0x1a   : > { %p917_p10 = pnand %p566_p5, %p39_p7  ;;  %s171_s28 = scalar_lea.sflag [#allocation3], %s170_s10 }
  0x1b   : > { %s643_s6 = sshra.s32 %s181_s23, 4  ;;  %s650_s12 = scalar_lea.hbm %s1017_s0, 128  ;;  %s644_s6 = int_to_ptr.hbm [resolvable:$true] %s643_s6 }
  0x1c   : > { %s645_s7 = scalar_lea.hbm %s644_s6, 32  ;;  %p647_p12 = pneg %p917_p10 }
  0x1d   : > { %p646_p11 = scmp.ne.s32.totalorder %s644_s6, %s645_s7  ;;  %p651_p5 = scmp.lt.s32.totalorder %s644_s6, %s1017_s0 }
  0x1e   : > { %p652_p7 = scmp.lt.s32.totalorder %s650_s12, %s645_s7 }
  0x1f   : > { %p648_p13 = pnand %p647_p12, %p646_p11 }
  0x20   : > { %p653_p2 = por %p652_p7, %p651_p5 }
  0x21   : > { %p649_p0 = pneg %p648_p13 }
  0x23   : > { %p654_p8 = pnand %p653_p2, %p649_p0 }
  0x25   : > { %657 = shalt.err (!%p654_p8)
}
  0x26   : > { %560 = dma.hbm_to_vmem [thread:$0]  (!%p917_p10), %s181_s23, 512, %s183_s25, %s171_s28, %s806_s30, %s806_s30, %s807_s5  }
  0x27   : > { %194 = sbr.rel (%p882_p9) target bundleno = 246 (0xf6), region = 28  ;;  %s937_s10 = sand.u32 (!%p882_p9), 1, %s795_s16  }
  0x28   : > { %s474_s24 = sshll.u32 (!%p882_p9), %s937_s10, 5  ;;  %s197_s6 = scalar_lea.sflag (!%p882_p9), [#allocation3], %s937_s10 }
  0x29   : > { %s941_s7 = scalar_lea.vmem (!%p882_p9), [#allocation2], %s474_s24 }
  0x2c   : > { %774 = dma.done.wait (%p868_p4), %s197_s6, 512  }
  0x2d   : > { %776 = vsyncadd (%p868_p4), %s197_s6, 4294966784 }
  0x2e   : > { %778 = dma.done.wait (%p44_p1), [#allocation6], 2048  }
  0x2f   : > { %780 = vsyncadd (%p44_p1), [#allocation6], 4294965248  ;;  %s951_s26 = scalar_lea.vmem [#allocation7], %s474_s24  ;;  %p1028_p2 = scmp.ne.s32.totalorder %s859_s19, 0 }
  0x31   : > { %236 = sbr.rel (%p1028_p2) target bundleno = 57 (0x39), region = 40 }
  0x36   : > { %v808_v0 = vmov 0.0  }
  0x37   : > { %237 = vst [vmem:[#allocation8] sm:$0x1] %v808_v0 }
  0x38   : > { %238 = vst [vmem:[#allocation10] sm:$0x1] %v808_v0 }
  0x39 PF: > { %v258_v1 = vld [vmem:[#allocation5 + $0x78] sm:$0xff]  ;;  %v257_v2 = vld [vmem:[#allocation5 + $0x70] sm:$0xff]  ;;  %v256_v3 = vld [vmem:[#allocation5 + $0x68] sm:$0xff]  ;;  %s488_s21 = sshll.u32 %s859_s19, 5  ;;  %s333_s25 = sshll.u32 %s951_s26, 4  ;;  %s966_s25 = int_to_ptr.vmem [resolvable:$true] %s333_s25 }
  0x3a   : > { %490 = vmatpush.msra.mxu2 %v258_v1  ;;  %491 = vmatpush.msra.mxu3 %v258_v1  ;;  %v255_v4 = vld [vmem:[#allocation5 + $0x60] sm:$0xff]  ;;  %v254_v5 = vld [vmem:[#allocation5 + $0x58] sm:$0xff]  ;;  %v253_v6 = vld [vmem:[#allocation5 + $0x50] sm:$0xff]  ;;  %s332_s23 = scalar_lea.hbm %s1019_s2, %s488_s21  ;;  %s321_s28 = scalar_lea.sflag [#allocation4], %s937_s10 }
  0x3b   : > { %259 = vmatpush.msra.mxu0 %v258_v1  ;;  %489 = vmatpush.msra.mxu1 %v258_v1  ;;  %v252_v7 = vld [vmem:[#allocation5 + $0x48] sm:$0xff]  ;;  %v251_v8 = vld [vmem:[#allocation5 + $0x40] sm:$0xff]  ;;  %v250_v9 = vld [vmem:[#allocation5 + $0x38] sm:$0xff]  ;;  %s335_s27 = sshll.u32 %s332_s23, 4  ;;  %s693_s20 = scalar_lea.hbm %s1019_s2, 128  ;;  %s968_s27 = int_to_ptr.hbm [resolvable:$true] %s335_s27 }
  0x3c   : > { %493 = vmatpush.msra.mxu2 %v257_v2  ;;  %494 = vmatpush.msra.mxu3 %v257_v2  ;;  %v249_v10 = vld [vmem:[#allocation5 + $0x30] sm:$0xff]  ;;  %v248_v11 = vld [vmem:[#allocation5 + $0x28] sm:$0xff]  ;;  %v247_v12 = vld [vmem:[#allocation5 + $0x20] sm:$0xff]  ;;  %s687_s11 = sshra.s32 %s968_s27, 4  ;;  %s688_s11 = int_to_ptr.hbm [resolvable:$true] %s687_s11 }
  0x3d   : > { %260 = vmatpush.msra.mxu0 %v257_v2  ;;  %492 = vmatpush.msra.mxu1 %v257_v2  ;;  %v246_v13 = vld [vmem:[#allocation5 + $0x18] sm:$0xff]  ;;  %v245_v14 = vld [vmem:[#allocation5 + $0x10] sm:$0xff]  ;;  %v244_v15 = vld [vmem:[#allocation5 + $0x8] sm:$0xff]  ;;  %s689_s13 = scalar_lea.hbm %s688_s11, 32  ;;  %p694_p9 = scmp.lt.s32.totalorder %s688_s11, %s1019_s2 }
  0x3e   : > { %496 = vmatpush.msra.mxu2 %v256_v3  ;;  %497 = vmatpush.msra.mxu3 %v256_v3  ;;  %v243_v16 = vld [vmem:[#allocation5] sm:$0xff]  ;;  %v241_v17 = vld [vmem:[%s941_s7 + $0x10] sm:$0xff]  ;;  %v242_v18 = vld [vmem:[%s941_s7 + $0x18] sm:$0xff]  ;;  %p690_p1 = scmp.ne.s32.totalorder %s688_s11, %s689_s13  ;;  %p695_p10 = scmp.lt.s32.totalorder %s693_s20, %s689_s13 }
  0x3f   : > { %261 = vmatpush.msra.mxu0 %v256_v3  ;;  %495 = vmatpush.msra.mxu1 %v256_v3  ;;  %v239_v19 = vld [vmem:[%s941_s7] sm:$0xff]  ;;  %v240_v20 = vld [vmem:[%s941_s7 + $0x8] sm:$0xff] }
  0x40   : > { %499 = vmatpush.msra.mxu2 %v255_v4  ;;  %500 = vmatpush.msra.mxu3 %v255_v4  ;;  %p691_p4 = pnand %p690_p1, %p907_p3  ;;  %p696_p11 = por %p695_p10, %p694_p9 }
  0x41   : > { %262 = vmatpush.msra.mxu0 %v255_v4  ;;  %498 = vmatpush.msra.mxu1 %v255_v4 }
  0x42   : > { %502 = vmatpush.msra.mxu2 %v254_v5  ;;  %503 = vmatpush.msra.mxu3 %v254_v5  ;;  %p692_p8 = pneg %p691_p4 }
  0x43   : > { %263 = vmatpush.msra.mxu0 %v254_v5  ;;  %501 = vmatpush.msra.mxu1 %v254_v5 }
  0x44   : > { %505 = vmatpush.msra.mxu2 %v253_v6  ;;  %506 = vmatpush.msra.mxu3 %v253_v6  ;;  %p697_p12 = pnand %p696_p11, %p692_p8 }
  0x45   : > { %264 = vmatpush.msra.mxu0 %v253_v6  ;;  %504 = vmatpush.msra.mxu1 %v253_v6 }
  0x46   : > { %508 = vmatpush.msra.mxu2 %v252_v7  ;;  %509 = vmatpush.msra.mxu3 %v252_v7 }
  0x47   : > { %265 = vmatpush.msra.mxu0 %v252_v7  ;;  %507 = vmatpush.msra.mxu1 %v252_v7 }
  0x48   : > { %511 = vmatpush.msra.mxu2 %v251_v8  ;;  %512 = vmatpush.msra.mxu3 %v251_v8 }
  0x49   : > { %266 = vmatpush.msra.mxu0 %v251_v8  ;;  %510 = vmatpush.msra.mxu1 %v251_v8 }
  0x4a   : > { %514 = vmatpush.msra.mxu2 %v250_v9  ;;  %515 = vmatpush.msra.mxu3 %v250_v9 }
  0x4b   : > { %267 = vmatpush.msra.mxu0 %v250_v9  ;;  %513 = vmatpush.msra.mxu1 %v250_v9 }
  0x4c   : > { %517 = vmatpush.msra.mxu2 %v249_v10  ;;  %518 = vmatpush.msra.mxu3 %v249_v10 }
  0x4d   : > { %268 = vmatpush.msra.mxu0 %v249_v10  ;;  %516 = vmatpush.msra.mxu1 %v249_v10 }
  0x4e   : > { %520 = vmatpush.msra.mxu2 %v248_v11  ;;  %521 = vmatpush.msra.mxu3 %v248_v11 }
  0x4f   : > { %269 = vmatpush.msra.mxu0 %v248_v11  ;;  %519 = vmatpush.msra.mxu1 %v248_v11 }
  0x50   : > { %523 = vmatpush.msra.mxu2 %v247_v12  ;;  %524 = vmatpush.msra.mxu3 %v247_v12 }
  0x51   : > { %270 = vmatpush.msra.mxu0 %v247_v12  ;;  %522 = vmatpush.msra.mxu1 %v247_v12 }
  0x52   : > { %526 = vmatpush.msra.mxu2 %v246_v13  ;;  %527 = vmatpush.msra.mxu3 %v246_v13 }
  0x53   : > { %271 = vmatpush.msra.mxu0 %v246_v13  ;;  %525 = vmatpush.msra.mxu1 %v246_v13 }
  0x54   : > { %529 = vmatpush.msra.mxu2 %v245_v14  ;;  %530 = vmatpush.msra.mxu3 %v245_v14 }
  0x55   : > { %272 = vmatpush.msra.mxu0 %v245_v14  ;;  %528 = vmatpush.msra.mxu1 %v245_v14 }
  0x56   : > { %532 = vmatpush.msra.mxu2 %v244_v15  ;;  %533 = vmatpush.msra.mxu3 %v244_v15 }
  0x57   : > { %273 = vmatpush.msra.mxu0 %v244_v15  ;;  %531 = vmatpush.msra.mxu1 %v244_v15 }
  0x58   : > { %535 = vmatpush.msra.mxu2 %v243_v16  ;;  %536 = vmatpush.msra.mxu3 %v243_v16 }
  0x59   : > { %281 = vmatmul.f32.vlgmr.msra.gmra.mxu2 %v241_v17  ;;  %284 = vmatmul.f32.vlgmr.msra.gmra.mxu3 %v242_v18 }
  0x5a   : > { %274 = vmatpush.msra.mxu0 %v243_v16  ;;  %534 = vmatpush.msra.mxu1 %v243_v16 }
  0x5b   : > { %275 = vmatmul.f32.vlgmr.msra.gmra.mxu0 %v239_v19  ;;  %278 = vmatmul.f32.vlgmr.msra.gmra.mxu1 %v240_v20 }
  0xd8   : > { %v276_v21 = vpop.f32.mrf.mxu0  ;;  %v279_v22 = vpop.f32.mrf.mxu1 }
  0xd9   : > { %288 = vst [vmem:[%s951_s26] sm:$0xff] %v276_v21  ;;  %v305_v23 = vmul.f32 %v276_v21, %v276_v21  ;;  %v293_v24 = vadd.f32 %v279_v22, %v276_v21  ;;  %v306_v25 = vmul.f32 %v279_v22, %v279_v22 }
  0xda   : > { %289 = vst [vmem:[%s951_s26 + $0x8] sm:$0xff] %v279_v22 }
  0xdb   : > { %v309_v26 = vadd.f32 %v306_v25, %v305_v23 }
  0xdc   : > { %v282_v27 = vpop.f32.mrf.mxu2  ;;  %v285_v28 = vpop.f32.mrf.mxu3 }
  0xdd   : > { %290 = vst [vmem:[%s951_s26 + $0x10] sm:$0xff] %v282_v27  ;;  %v294_v29 = vadd.f32 %v293_v24, %v282_v27  ;;  %v307_v30 = vmul.f32 %v282_v27, %v282_v27  ;;  %v308_v31 = vmul.f32 %v285_v28, %v285_v28 }
  0xde   : > { %291 = vst [vmem:[%s951_s26 + $0x18] sm:$0xff] %v285_v28 }
  0xdf   : > { %v310_v32 = vadd.f32 %v309_v26, %v307_v30  ;;  %v295_v33 = vadd.f32 %v294_v29, %v285_v28 }
  0xe0   : > { %700 = shalt.err (!%p697_p12)
}
  0xe1   : > { %s809_s10 = smov 128   ;;  %s810_s7 = smov 8   ;;  %v296_v34 = vrot.slane %v295_v33, 4  ;;  %v311_v35 = vadd.f32 %v310_v32, %v308_v31  ;;  %v292_v44 = vld [vmem:[#allocation8] sm:$0x1] }
  0xe2   : > { %543 = dma.vmem_to_hbm [thread:$0]  (%p907_p3), %s966_s25, 512, %s968_s27, %s321_s28, %s809_s10, %s809_s10, %s810_s7   ;;  %v304_v47 = vld [vmem:[#allocation10] sm:$0x1] }
  0xe3   : > { %v297_v36 = vadd.f32 %v296_v34, %v295_v33  ;;  %v312_v37 = vrot.slane %v311_v35, 4  ;;  %s811_s26 = smov [#allocation8]   ;;  %s350_s23 = sshll.u32 %s1020_s3, 4  ;;  %s351_s23 = int_to_ptr.hbm [resolvable:$true] %s350_s23 }
  0xe4   : > { %s348_s21 = sshll.u32 %s811_s26, 4  ;;  %s812_s9 = smov [#allocation10]   ;;  %s349_s21 = int_to_ptr.vmem [resolvable:$true] %s348_s21 }
  0xe5   : > { %v298_v38 = vrot.slane %v297_v36, 2  ;;  %v313_v39 = vadd.f32 %v312_v37, %v311_v35  ;;  %s360_s25 = sshll.u32 %s812_s9, 4  ;;  %s362_s11 = sshll.u32 %s1021_s4, 4  ;;  %s361_s25 = int_to_ptr.vmem [resolvable:$true] %s360_s25  ;;  %s363_s11 = int_to_ptr.hbm [resolvable:$true] %s362_s11 }
  0xe6   : > { %p1029_p3 = scmp.eq.s32.totalorder %s859_s19, 3 }
  0xe7   : > { %v299_v40 = vadd.f32 %v298_v38, %v297_v36  ;;  %v314_v41 = vrot.slane %v313_v39, 2 }
  0xe8   : > { %p1030_p13 = pmov %p1029_p3  ;;  %p1031_p0 = pmov %p1029_p3 }
  0xe9   : > { %v315_v42 = vadd.f32 %v314_v41, %v313_v39  ;;  %v300_v43 = vrot.slane %v299_v40, 1 }
  0xeb   : > { %v301_v45 = vadd.f32 %v300_v43, %v299_v40  ;;  %v316_v46 = vrot.slane %v315_v42, 1 }
  0xed   : > { %v302_v48 = vadd.f32 %v301_v45, %v292_v44  ;;  %v317_v49 = vadd.f32 %v316_v46, %v315_v42 }
  0xef   : > { %303 = vst [vmem:[#allocation8] sm:$0x1] %v302_v48  ;;  %v318_v50 = vadd.f32 %v317_v49, %v304_v47 }
  0xf0   : > { %545 = dma.vmem_to_hbm [thread:$0]  (%p1029_p3), %s349_s21, 16, %s351_s23, [#allocation9]  }
  0xf1   : > { %319 = vst [vmem:[#allocation10] sm:$0x1] %v318_v50 }
  0xf2   : > { %547 = dma.vmem_to_hbm [thread:$0]  (%p1030_p13), %s361_s25, 16, %s363_s11, [#allocation9]  }
  0xf3   : > { %782 = dma.done.wait (%p1031_p0), [#allocation9], 32   ;;  %p1032_p5 = pmov %p1031_p0 }
  0xf5   : > { %784 = vsyncadd (%p1032_p5), [#allocation9], 4294967264 }
  0xf6 PF: > { %p572_p7 = scmp.ge.s32.totalorder %s803_s18, 2  ;;  %s384_s13 = sand.u32 1, %s791_s15  }
  0xf7   : > { %s385_s12 = scalar_lea.sflag [#allocation4], %s384_s13 }
  0xf8   : > { %p562_p2 = pnand %p572_p7, %p873_p6 }
  0xfa   : > { %p563_p1 = pneg %p562_p2 }
  0xfc   : > { %786 = dma.done.wait (%p563_p1), %s385_s12, 512  }
  0xfd   : > { %788 = vsyncadd (%p563_p1), %s385_s12, 4294966784  ;;  %p20_p4 = scmp.ge.s32.totalorder %s891_s29, 6   ;;  %s1033_s15 = smov %s795_s16 }
  0xfe   : > { %s1034_s16 = smov %s799_s17  ;;  %s1035_s17 = smov %s903_s8 }
  0xff   : > { %s1036_s18 = smov %s891_s29  ;;  %22 = sbr.rel (!%p20_p4) target bundleno = 7 (0x7), region = 97 }
 0x104   :  { %391 = vsyncpa [#allocation3], 1 }
 0x105   :  { %393 = vsyncpa [#allocation3 + $0x1], 1 }
 0x106   :  { %394 = vsyncpa [#allocation6], 1 }
 0x107   :  { %395 = vsyncpa [#allocation4], 1 }
 0x108   :  { %397 = vsyncpa [#allocation4 + $0x1], 1 }
 0x109   :  { %398 = vsyncpa [#allocation9], 1 }

</bundles_post_ra>
